<compile_context>
chip_gen: v5e
topology: v5e:2x2
jax: 0.10.0
libtpu: 0.0.40
codegen_flags: <defaults>
</compile_context>

<pallas_src>
import jax
import jax.numpy as jnp
from jax.experimental import pallas as pl
from jax.experimental.pallas import tpu as pltpu

LANE = 128
SUBLANE = 8


def _round_up(v, m):
    return (v + m - 1) // m * m


# ----------------------------------------------------------------------------
# Fused two-layer GCN kernel factory.  Grid = (layer l in {0,1}, row tile i).
#   refs: a_ref  resident : (n_pad, n_pad) bf16 (DMA'd once, sliced in-kernel)
#                streaming: (tm, n_pad)    bf16 (row strip per grid step)
#         z1_ref (n_pad, f_pad) bf16  -- x @ W1, precomputed in the wrapper
#         w2_ref (f_pad, f_pad) bf16
#         b_ref  (8, f_pad)     f32   -- layer-indexed bias block (row 0 valid)
#         o_ref  (tm, f_pad)    f32   -- output row tile (written at l==1 only)
#         z_ref  (n_pad, f_pad) bf16  -- scratch: Z of the current layer
#         h_ref  (n_pad, f_pad) bf16  -- scratch: layer-1 activations
# ----------------------------------------------------------------------------
def _make_fused_kernel(tm, a_resident):
    def kernel(a_ref, z1_ref, w2_ref, b_ref, o_ref, z_ref, h_ref):
        l = pl.program_id(0)          # layer index
        i = pl.program_id(1)          # A_hat row tile

        # Layer-0 feature transform was hoisted to the wrapper; stage it into
        # the per-layer Z scratch once (cheap VMEM->VMEM copy).
        @pl.when(jnp.logical_and(l == 0, i == 0))
        def _():
            z_ref[...] = z1_ref[...]

        # Layer-1 feature transform, computed ONCE (H is VMEM-resident).
        @pl.when(jnp.logical_and(l == 1, i == 0))
        def _():
            z_ref[...] = jnp.dot(
                h_ref[...], w2_ref[...],
                preferred_element_type=jnp.float32).astype(z_ref.dtype)

        row0 = pl.multiple_of(i * tm, tm)
        if a_resident:
            a_tile = a_ref[pl.ds(row0, tm), :]      # slice resident A in VMEM
        else:
            a_tile = a_ref[...]                     # streamed row strip

        # Normalized aggregation for this row strip on the MXU.
        agg = jnp.dot(a_tile, z_ref[...], preferred_element_type=jnp.float32)

        # Bias + ReLU epilogue in f32 on the VPU (bias row selected by layer
        # through its BlockSpec -> no per-step select).
        act = jnp.maximum(agg + b_ref[0:1, :], 0.0)

        @pl.when(l == 0)
        def _():
            # Layer-1 activations stay resident in VMEM (no HBM round trip).
            # TODO(synk): F.dropout(training=True) not applied (eval identity).
            h_ref[pl.ds(row0, tm), :] = act.astype(h_ref.dtype)

        @pl.when(l == 1)
        def _():
            o_ref[...] = act.astype(o_ref.dtype)

    return kernel


# ----------------------------------------------------------------------------
# Plain-JAX glue: dense normalized adjacency (PyG gcn_norm semantics).
#   - multi-edges accumulate weight (scatter-add, like PyG's scatter)
#   - self-loops added only where missing (add_remaining_self_loops)
# ----------------------------------------------------------------------------
def build_normalized_adjacency(edge_index, num_nodes):
    src = edge_index[0]   # message sources
    dst = edge_index[1]   # message targets
    adj = jnp.zeros((num_nodes, num_nodes), jnp.float32).at[dst, src].add(1.0)
    diag = jnp.diagonal(adj)
    adj = adj + jnp.diag(jnp.where(diag == 0.0, 1.0, 0.0))
    deg = adj.sum(axis=1)
    deg_inv_sqrt = jnp.where(deg > 0, jax.lax.rsqrt(deg), 0.0)
    return deg_inv_sqrt[:, None] * adj * deg_inv_sqrt[None, :]


def _vmem_capacity_bytes():
    try:
        return int(pltpu.get_tpu_info().vmem_capacity_bytes)
    except Exception:
        return 64 * 1024 * 1024        # conservative fallback (v7x-sized VMEM)


# ----------------------------------------------------------------------------
# TDGCN forward (wrapper): padding, bf16 casts, single fused pallas_call.
# ----------------------------------------------------------------------------
def tdgcn_forward(x, edge_index, params):
    n, in_dim = x.shape
    hid = params["w1"].shape[1]
    out_dim = params["w2"].shape[1]

    a_hat = build_normalized_adjacency(edge_index, n)

    # Geometry: pad N to 128 lanes (not to tm), pick tm as a divisor of n_pad.
    f_pad = max(_round_up(in_dim, LANE), _round_up(hid, LANE),
                _round_up(out_dim, LANE))
    n_pad = _round_up(n, LANE)
    tm = next(t for t in (512, 256, 128) if n_pad % t == 0)
    r = n_pad // tm

    bf = jnp.bfloat16
    # Layer-0 feature transform hoisted out of the kernel (tiny XLA matmul).
    z1 = jnp.dot(x.astype(jnp.float32), params["w1"].astype(jnp.float32))

    a_p = jnp.zeros((n_pad, n_pad), bf).at[:n, :n].set(a_hat.astype(bf))
    z1_p = jnp.zeros((n_pad, f_pad), bf).at[:n, :hid].set(z1.astype(bf))
    w2_p = jnp.zeros((f_pad, f_pad), bf).at[:hid, :out_dim].set(
        params["w2"].astype(bf))
    # Layer-indexed bias: rows [8*l, 8*l+8) hold the bias of layer l
    # (sublane-aligned so the (8, f_pad) BlockSpec is layout-legal).
    b_p = (jnp.zeros((2 * SUBLANE, f_pad), jnp.float32)
           .at[0, :hid].set(params["b1"].astype(jnp.float32))
           .at[SUBLANE, :out_dim].set(params["b2"].astype(jnp.float32)))

    # Generation-aware VMEM budget (count 2x buffers for every BlockSpec input)
    # and A-residency decision.
    vmem_cap = _vmem_capacity_bytes()
    common = (2 * n_pad * f_pad * 2            # Z1 input (double-buffered)
              + 2 * f_pad * f_pad * 2          # W2 input
              + 2 * 2 * SUBLANE * f_pad * 4    # bias input
              + 2 * tm * f_pad * 4             # output tile
              + 2 * n_pad * f_pad * 2)         # scratch: Z + H
    need_resident = common + 2 * n_pad * n_pad * 2     # whole A, double-buffered
    need_stream = common + 2 * tm * n_pad * 2          # A row strip
    a_resident = need_resident <= int(0.85 * vmem_cap)
    vmem_need = need_resident if a_resident else need_stream
    vmem_limit = int(min(max(int(1.25 * vmem_need), 32 * 1024 * 1024),
                         vmem_cap - 2 * 1024 * 1024))

    if a_resident:
        # A DMA'd into VMEM once and reused by BOTH layers (constant index_map).
        a_spec = pl.BlockSpec((n_pad, n_pad), lambda l, i: (0, 0))
    else:
        # TODO(synk): for very large graphs (esp. v7x 64 MiB VMEM) tile the
        # K (A-column) axis with a third grid dim instead of full-width strips.
        a_spec = pl.BlockSpec((tm, n_pad), lambda l, i: (i, 0))

    # Cost estimate: H@W2 transform + two aggregations; A read once if resident.
    flops = 2 * n_pad * f_pad * f_pad + 2 * (2 * n_pad * n_pad * f_pad)
    a_reads = 1 if a_resident else 2
    bytes_accessed = (a_reads * a_p.size * 2 + z1_p.size * 2 + w2_p.size * 2
                      + b_p.size * 4 + n_pad * f_pad * 4)

    kernel = _make_fused_kernel(tm, a_resident)

    out_p = pl.pallas_call(
        kernel,
        out_shape=jax.ShapeDtypeStruct((n_pad, f_pad), jnp.float32),
        grid_spec=pltpu.PrefetchScalarGridSpec(
            num_scalar_prefetch=0,
            grid=(2, r),                                        # (layer, row tile)
            in_specs=[
                a_spec,                                              # A_hat
                pl.BlockSpec((n_pad, f_pad), lambda l, i: (0, 0)),   # Z1 = x@W1
                pl.BlockSpec((f_pad, f_pad), lambda l, i: (0, 0)),   # W2
                pl.BlockSpec((SUBLANE, f_pad), lambda l, i: (l, 0)), # bias[layer]
            ],
            # Pin all layer-0 steps to output block (0, 0): no uninitialized
            # tiles are ever written back to HBM; layer 1 visits (i, 0) and
            # fully writes each block before its writeback.
            out_specs=pl.BlockSpec((tm, f_pad), lambda l, i: (i * l, 0)),
            scratch_shapes=[
                pltpu.VMEM((n_pad, f_pad), bf),   # Z of the current layer
                pltpu.VMEM((n_pad, f_pad), bf),   # H = layer-1 activations
            ],
        ),
        compiler_params=pltpu.CompilerParams(
            # Row axis must stay "arbitrary": layer 1 reads ALL rows of the
            # VMEM-resident H produced by layer 0.
            # TODO(synk): on v7x (2 TCs) shard rows across cores via core_map
            # with a shared H (or split into two calls with "parallel" rows).
            dimension_semantics=("arbitrary", "arbitrary"),
            vmem_limit_bytes=vmem_limit,
        ),
        cost_estimate=pl.CostEstimate(flops=flops, transcendentals=0,
                                      bytes_accessed=bytes_accessed),
    )(a_p, z1_p, w2_p, b_p)

    return out_p[:n, :out_dim]


# ----------------------------------------------------------------------------
# Pure-JAX reference (for numerical sanity) and parameter init.
# ----------------------------------------------------------------------------
def tdgcn_reference(x, edge_index, params):
    a_hat = build_normalized_adjacency(edge_index, x.shape[0])
    h = jnp.maximum(a_hat @ (x @ params["w1"]) + params["b1"], 0.0)
    return jnp.maximum(a_hat @ (h @ params["w2"]) + params["b2"], 0.0)


def init_params(key, in_dim, hid_dim, out_dim):
    k1, k2 = jax.random.split(key)
    s1 = (6.0 / (in_dim + hid_dim)) ** 0.5
    s2 = (6.0 / (hid_dim + out_dim)) ** 0.5
    return {
        "w1": jax.random.uniform(k1, (in_dim, hid_dim), jnp.float32, -s1, s1),
        "b1": jnp.zeros((hid_dim,), jnp.float32),
        "w2": jax.random.uniform(k2, (hid_dim, out_dim), jnp.float32, -s2, s2),
        "b2": jnp.zeros((out_dim,), jnp.float32),
    }


if __name__ == "__main__":
    key = jax.random.PRNGKey(0)
    k_x, k_e, k_p = jax.random.split(key, 3)

    # Small synthetic graph: 32 nodes, 16-d features, 48 directed edges.
    N, IN_DIM, HID_DIM, OUT_DIM, E = 32, 16, 32, 8, 48
    x = jax.random.normal(k_x, (N, IN_DIM), dtype=jnp.float32)
    edge_index = jax.random.randint(k_e, (2, E), 0, N, dtype=jnp.int32)
    params = init_params(k_p, IN_DIM, HID_DIM, OUT_DIM)

    out = jax.jit(tdgcn_forward)(x, edge_index, params)
    jax.block_until_ready(out)

    ref = tdgcn_reference(x, edge_index, params)

    assert out.shape == (N, OUT_DIM)
    assert bool(jnp.all(out >= 0.0))                       # final ReLU
    assert bool(jnp.allclose(out, ref, atol=1e-1, rtol=1e-1))  # bf16 tolerance
    print("KERNEL_OK")
</pallas_src>

<mosaic_0001>
module attributes {stable_mosaic.version = 11 : i64} {
  func.func @kernel(%arg0: i32, %arg1: i32, %arg2: memref<128x128xbf16, #tpu.memory_space<vmem>>, %arg3: memref<128x128xbf16, #tpu.memory_space<vmem>>, %arg4: memref<128x128xbf16, #tpu.memory_space<vmem>>, %arg5: memref<8x128xf32, #tpu.memory_space<vmem>>, %arg6: memref<128x128xf32, #tpu.memory_space<vmem>>, %arg7: memref<128x128xbf16, #tpu.memory_space<vmem>>, %arg8: memref<128x128xbf16, #tpu.memory_space<vmem>>) attributes {dimension_semantics = [#tpu.dimension_semantics<arbitrary>, #tpu.dimension_semantics<arbitrary>], iteration_bounds = array<i64: 2, 1>, scalar_prefetch = 0 : i64, scratch_operands = 2 : i64, tpu.core_type = #tpu.core_type<tc>, window_params = [{pipeline_mode = #tpu.pipeline_mode<synchronous>, transform_indices = @transform_0, window_bounds = array<i64: 128, 128>}, {pipeline_mode = #tpu.pipeline_mode<synchronous>, transform_indices = @transform_1, window_bounds = array<i64: 128, 128>}, {pipeline_mode = #tpu.pipeline_mode<synchronous>, transform_indices = @transform_2, window_bounds = array<i64: 128, 128>}, {transform_indices = @transform_3, window_bounds = array<i64: 8, 128>}, {transform_indices = @transform_4, window_bounds = array<i64: 128, 128>}]} {
    %c0_i32 = arith.constant 0 : i32
    %0 = arith.cmpi eq, %arg0, %c0_i32 : i32
    %c0_i32_0 = arith.constant 0 : i32
    %1 = arith.cmpi eq, %arg1, %c0_i32_0 : i32
    %2 = arith.andi %0, %1 : i1
    %3 = arith.extui %2 : i1 to i32
    %c0_i32_1 = arith.constant 0 : i32
    %4 = arith.cmpi ne, %3, %c0_i32_1 : i32
    scf.if %4 {
      %c0_13 = arith.constant 0 : index
      %c0_14 = arith.constant 0 : index
      %27 = vector.load %arg3[%c0_13, %c0_14] : memref<128x128xbf16, #tpu.memory_space<vmem>>, vector<128x128xbf16>
      %c0_15 = arith.constant 0 : index
      %c0_16 = arith.constant 0 : index
      %28 = vector.load %arg7[%c0_15, %c0_16] : memref<128x128xbf16, #tpu.memory_space<vmem>>, vector<128x128xbf16>
      tpu.vector_store %arg7[%c0_15, %c0_16], %27 {strides = array<i32>} : memref<128x128xbf16, #tpu.memory_space<vmem>>, vector<128x128xbf16>,
    } else {
    }
    %c1_i32 = arith.constant 1 : i32
    %5 = arith.cmpi eq, %arg0, %c1_i32 : i32
    %c0_i32_2 = arith.constant 0 : i32
    %6 = arith.cmpi eq, %arg1, %c0_i32_2 : i32
    %7 = arith.andi %5, %6 : i1
    %8 = arith.extui %7 : i1 to i32
    %c0_i32_3 = arith.constant 0 : i32
    %9 = arith.cmpi ne, %8, %c0_i32_3 : i32
    scf.if %9 {
      %c0_13 = arith.constant 0 : index
      %c0_14 = arith.constant 0 : index
      %27 = vector.load %arg8[%c0_13, %c0_14] : memref<128x128xbf16, #tpu.memory_space<vmem>>, vector<128x128xbf16>
      %c0_15 = arith.constant 0 : index
      %c0_16 = arith.constant 0 : index
      %28 = vector.load %arg4[%c0_15, %c0_16] : memref<128x128xbf16, #tpu.memory_space<vmem>>, vector<128x128xbf16>
      %cst_17 = arith.constant dense<0.000000e+00> : vector<128x128xf32>
      %29 = tpu.matmul %27, %28, %cst_17 {dimension_numbers = #tpu.dot_dimension_numbers<[1], [0], [0], [1], [0, 0, 1, 1], [], []>} : vector<128x128xbf16>, vector<128x128xbf16>, vector<128x128xf32> -> vector<128x128xf32>
      %30 = arith.truncf %29 : vector<128x128xf32> to vector<128x128xbf16>
      %c0_18 = arith.constant 0 : index
      %c0_19 = arith.constant 0 : index
      %31 = vector.load %arg7[%c0_18, %c0_19] : memref<128x128xbf16, #tpu.memory_space<vmem>>, vector<128x128xbf16>
      tpu.vector_store %arg7[%c0_18, %c0_19], %30 {strides = array<i32>} : memref<128x128xbf16, #tpu.memory_space<vmem>>, vector<128x128xbf16>,
    } else {
    }
    %c128_i32 = arith.constant 128 : i32
    %10 = arith.muli %arg1, %c128_i32 : i32
    %11 = tpu.assume_multiple %10, 128 : i32
    %12 = arith.index_cast %11 : i32 to index
    %c0 = arith.constant 0 : index
    %13 = vector.load %arg2[%12, %c0] : memref<128x128xbf16, #tpu.memory_space<vmem>>, vector<128x128xbf16>
    %c0_4 = arith.constant 0 : index
    %c0_5 = arith.constant 0 : index
    %14 = vector.load %arg7[%c0_4, %c0_5] : memref<128x128xbf16, #tpu.memory_space<vmem>>, vector<128x128xbf16>
    %cst = arith.constant dense<0.000000e+00> : vector<128x128xf32>
    %15 = tpu.matmul %13, %14, %cst {dimension_numbers = #tpu.dot_dimension_numbers<[1], [0], [0], [1], [0, 0, 1, 1], [], []>} : vector<128x128xbf16>, vector<128x128xbf16>, vector<128x128xf32> -> vector<128x128xf32>
    %c0_6 = arith.constant 0 : index
    %c0_7 = arith.constant 0 : index
    %16 = vector.load %arg5[%c0_6, %c0_7] : memref<8x128xf32, #tpu.memory_space<vmem>>, vector<1x128xf32>
    %17 = vector.broadcast %16 : vector<1x128xf32> to vector<128x128xf32>
    %18 = arith.addf %15, %17 : vector<128x128xf32>
    %cst_8 = arith.constant 0.000000e+00 : f32
    %19 = vector.broadcast %cst_8 : f32 to vector<128x128xf32>
    %20 = arith.maximumf %18, %19 : vector<128x128xf32>
    %c0_i32_9 = arith.constant 0 : i32
    %21 = arith.cmpi eq, %arg0, %c0_i32_9 : i32
    %22 = arith.extui %21 : i1 to i32
    %c0_i32_10 = arith.constant 0 : i32
    %23 = arith.cmpi ne, %22, %c0_i32_10 : i32
    scf.if %23 {
      %27 = arith.truncf %20 : vector<128x128xf32> to vector<128x128xbf16>
      %28 = arith.index_cast %11 : i32 to index
      %c0_13 = arith.constant 0 : index
      %29 = vector.load %arg8[%28, %c0_13] : memref<128x128xbf16, #tpu.memory_space<vmem>>, vector<128x128xbf16>
      tpu.vector_store %arg8[%28, %c0_13], %27 {strides = array<i32>} : memref<128x128xbf16, #tpu.memory_space<vmem>>, vector<128x128xbf16>,
    } else {
    }
    %c1_i32_11 = arith.constant 1 : i32
    %24 = arith.cmpi eq, %arg0, %c1_i32_11 : i32
    %25 = arith.extui %24 : i1 to i32
    %c0_i32_12 = arith.constant 0 : i32
    %26 = arith.cmpi ne, %25, %c0_i32_12 : i32
    scf.if %26 {
      %c0_13 = arith.constant 0 : index
      %c0_14 = arith.constant 0 : index
      %27 = vector.load %arg6[%c0_13, %c0_14] : memref<128x128xf32, #tpu.memory_space<vmem>>, vector<128x128xf32>
      tpu.vector_store %arg6[%c0_13, %c0_14], %20 {strides = array<i32>} : memref<128x128xf32, #tpu.memory_space<vmem>>, vector<128x128xf32>,
    } else {
    }
    return
  }
  func.func @transform_0(%arg0: i32, %arg1: i32) -> (i32, i32) {
    %c0_i32 = arith.constant 0 : i32
    %c0_i32_0 = arith.constant 0 : i32
    %c0_i32_1 = arith.constant 0 : i32
    return %c0_i32, %c0_i32_0 : i32, i32
  }
  func.func @transform_1(%arg0: i32, %arg1: i32) -> (i32, i32) {
    %c0_i32 = arith.constant 0 : i32
    %c0_i32_0 = arith.constant 0 : i32
    %c0_i32_1 = arith.constant 0 : i32
    return %c0_i32, %c0_i32_0 : i32, i32
  }
  func.func @transform_2(%arg0: i32, %arg1: i32) -> (i32, i32) {
    %c0_i32 = arith.constant 0 : i32
    %c0_i32_0 = arith.constant 0 : i32
    %c0_i32_1 = arith.constant 0 : i32
    return %c0_i32, %c0_i32_0 : i32, i32
  }
  func.func @transform_3(%arg0: i32, %arg1: i32) -> (i32, i32) {
    %c0_i32 = arith.constant 0 : i32
    %c0_i32_0 = arith.constant 0 : i32
    return %arg0, %c0_i32 : i32, i32
  }
  func.func @transform_4(%arg0: i32, %arg1: i32) -> (i32, i32) {
    %0 = arith.muli %arg1, %arg0 : i32
    %c0_i32 = arith.constant 0 : i32
    %c0_i32_0 = arith.constant 0 : i32
    return %0, %c0_i32 : i32, i32
  }
}

</mosaic_0001>

<bundles_post_ra>
// kernel: tdgcn_forward.1
= control target key start
LH: loop header
LB: loop body
LE: loop exit
PB: predicated region body
PF: predicated region fallthrough
CT: control target
= control target key end

     0   :  { %s1185_s15 = smov 0   ;;  %s1187_s16 = smov 0   ;;  %s1370_s0 = inlined_call_operand.vmem [shape: bf16[128,128], index: 0, kind: input, shape index: {}]   ;;  %s1371_s1 = inlined_call_operand.vmem [shape: bf16[128,128], index: 1, kind: input, shape index: {}]   ;;  %s1372_s2 = inlined_call_operand.vmem [shape: bf16[128,128], index: 2, kind: input, shape index: {}]   ;;  %s1373_s3 = inlined_call_operand.vmem [shape: f32[16,128], index: 3, kind: input, shape index: {}]   ;;  %s1374_s4 = inlined_call_operand.vmem [shape: f32[128,128], index: 4, kind: output, shape index: {}]  }
   0x1   :  { %s1189_s17 = smov 0  }
   0x2 LB: > { %s26_s18 = sadd.s32 1, %s1154_s16  ;;  %p797_p0 = scmp.ge.s32.totalorder %s1158_s17, 1  ;;  %s1158_s17 = sphi %s1189_s17, %s14_s17   ;;  %s1154_s16 = sphi %s1187_s16, %s1376_s16   ;;  %s1150_s15 = sphi %s1185_s15, %s1375_s15  }
   0x3   : > { %p28_p1 = scmp.ge.s32.totalorder %s26_s18, 2  ;;  %p175_p2 = scmp.lt.s32.totalorder %s1158_s17, 3 }
   0x5   : > { %s1378_s18 = smov (%p28_p1, %s26_s18), 0  ;;  %p176_p3 = pnand %p797_p0, %p175_p2 }
   0x6   : > { %p201_p4 = scmp.lt.s32.totalorder (!%p176_p3), %s1150_s15, 1  ;;  %p213_p5 = scmp.eq.s32.totalorder (!%p176_p3), %s1150_s15, 0 }
   0x7   : > { %179 = sbr.rel (%p176_p3) target bundleno = 446 (0x1be), region = 36 }
   0xc   : > { %s202_s19 = scalar_select %p201_p4, %s1150_s15, 1  ;;  %v219_v0 = vld [vmem:[%s1371_s1] sm:$0xff] (%p213_p5)   ;;  %v221_v1 = vld [vmem:[%s1371_s1 + $0x8] sm:$0xff] (%p213_p5)   ;;  %v223_v2 = vld [vmem:[%s1371_s1 + $0x10] sm:$0xff] (%p213_p5)  }
   0xd   : > { %218 = sbr.rel (!%p213_p5) target bundleno = 21 (0x15), region = 40  ;;  %235 = vst [vmem:[#allocation2] sm:$0xff] (%p213_p5), %v219_v0   ;;  %v225_v3 = vld [vmem:[%s1371_s1 + $0x18] sm:$0xff] (%p213_p5)   ;;  %v227_v4 = vld [vmem:[%s1371_s1 + $0x20] sm:$0xff] (%p213_p5)   ;;  %v229_v5 = vld [vmem:[%s1371_s1 + $0x28] sm:$0xff] (%p213_p5)  }
   0xe   : > { %s798_s20 = sshll.u32 %s202_s19, 3  ;;  %237 = vst [vmem:[#allocation2 + $0x8] sm:$0xff] (%p213_p5), %v221_v1   ;;  %v231_v6 = vld [vmem:[%s1371_s1 + $0x30] sm:$0xff] (%p213_p5)   ;;  %v233_v7 = vld [vmem:[%s1371_s1 + $0x38] sm:$0xff] (%p213_p5)  }
   0xf   : > { %s1211_s23 = scalar_lea.vmem %s1373_s3, %s798_s20  ;;  %239 = vst [vmem:[#allocation2 + $0x10] sm:$0xff] (%p213_p5), %v223_v2  }
  0x10   : > { %241 = vst [vmem:[#allocation2 + $0x18] sm:$0xff] (%p213_p5), %v225_v3  }
  0x11   : > { %243 = vst [vmem:[#allocation2 + $0x20] sm:$0xff] (%p213_p5), %v227_v4  }
  0x12   : > { %245 = vst [vmem:[#allocation2 + $0x28] sm:$0xff] %v229_v5  }
  0x13   : > { %247 = vst [vmem:[#allocation2 + $0x30] sm:$0xff] %v231_v6  }
  0x14   : > { %249 = vst [vmem:[#allocation2 + $0x38] sm:$0xff] %v233_v7  }
  0x15 PF: > { %p251_p6 = scmp.eq.s32.totalorder %s1150_s15, 1 }
  0x16   : > { %v952_v8 = vld [vmem:[%s1372_s2 + $0x38] sm:$0xff] (%p251_p6)  ;;  %v951_v9 = vld [vmem:[%s1372_s2 + $0x30] sm:$0xff] (%p251_p6)  ;;  %v950_v10 = vld [vmem:[%s1372_s2 + $0x28] sm:$0xff] (%p251_p6) }
  0x17   : > { %255 = sbr.rel (!%p251_p6) target bundleno = 215 (0xd7), region = 44  ;;  %384 = vmatpush.bf16.msra.mxu0 (%p251_p6), %v952_v8  ;;  %1063 = vmatpush.bf16.msra.mxu1 (%p251_p6), %v952_v8  ;;  %v949_v11 = vld [vmem:[%s1372_s2 + $0x20] sm:$0xff] (%p251_p6)  ;;  %v948_v12 = vld [vmem:[%s1372_s2 + $0x18] sm:$0xff] (%p251_p6)  ;;  %v947_v13 = vld [vmem:[%s1372_s2 + $0x10] sm:$0xff] (%p251_p6) }
  0x18   : > { %1064 = vmatpush.bf16.msra.mxu2 (%p251_p6), %v952_v8  ;;  %1065 = vmatpush.bf16.msra.mxu3 (%p251_p6), %v952_v8  ;;  %v946_v14 = vld [vmem:[%s1372_s2 + $0x8] sm:$0xff] (%p251_p6)  ;;  %v945_v15 = vld [vmem:[%s1372_s2] sm:$0xff] (%p251_p6)  ;;  %v937_v16 = vld [vmem:[#allocation3 + $0x30] sm:$0xff] (%p251_p6) }
  0x19   : > { %v939_v17 = vld [vmem:[#allocation3 + $0x18] sm:$0xff] (%p251_p6)  ;;  %v941_v18 = vld [vmem:[#allocation3 + $0x8] sm:$0xff] (%p251_p6)  ;;  %v938_v20 = vld [vmem:[#allocation3] sm:$0xff] (%p251_p6) }
  0x1a   : > { %v943_v19 = vld [vmem:[#allocation3 + $0x28] sm:$0xff] (%p251_p6)  ;;  %v940_v21 = vld [vmem:[#allocation3 + $0x10] sm:$0xff] (%p251_p6)  ;;  %v942_v22 = vld [vmem:[#allocation3 + $0x20] sm:$0xff] (%p251_p6) }
  0x1b   : > { %385 = vmatpush.bf16.msra.mxu0 (%p251_p6), %v951_v9  ;;  %1066 = vmatpush.bf16.msra.mxu1 (%p251_p6), %v951_v9  ;;  %v944_v23 = vld [vmem:[#allocation3 + $0x38] sm:$0xff] (%p251_p6) }
  0x1c   : > { %1067 = vmatpush.bf16.msra.mxu2 %v951_v9  ;;  %1068 = vmatpush.bf16.msra.mxu3 %v951_v9 }
  0x1f   : > { %386 = vmatpush.bf16.msra.mxu0 %v950_v10  ;;  %1069 = vmatpush.bf16.msra.mxu1 %v950_v10 }
  0x20   : > { %1070 = vmatpush.bf16.msra.mxu2 %v950_v10  ;;  %1071 = vmatpush.bf16.msra.mxu3 %v950_v10 }
  0x23   : > { %387 = vmatpush.bf16.msra.mxu0 %v949_v11  ;;  %1072 = vmatpush.bf16.msra.mxu1 %v949_v11 }
  0x24   : > { %1073 = vmatpush.bf16.msra.mxu2 %v949_v11  ;;  %1074 = vmatpush.bf16.msra.mxu3 %v949_v11 }
  0x27   : > { %388 = vmatpush.bf16.msra.mxu0 %v948_v12  ;;  %1075 = vmatpush.bf16.msra.mxu1 %v948_v12 }
  0x28   : > { %1076 = vmatpush.bf16.msra.mxu2 %v948_v12  ;;  %1077 = vmatpush.bf16.msra.mxu3 %v948_v12 }
  0x2b   : > { %389 = vmatpush.bf16.msra.mxu0 %v947_v13  ;;  %1078 = vmatpush.bf16.msra.mxu1 %v947_v13 }
  0x2c   : > { %1079 = vmatpush.bf16.msra.mxu2 %v947_v13  ;;  %1080 = vmatpush.bf16.msra.mxu3 %v947_v13 }
  0x2f   : > { %390 = vmatpush.bf16.msra.mxu0 %v946_v14  ;;  %1081 = vmatpush.bf16.msra.mxu1 %v946_v14 }
  0x30   : > { %1082 = vmatpush.bf16.msra.mxu2 %v946_v14  ;;  %1083 = vmatpush.bf16.msra.mxu3 %v946_v14 }
  0x33   : > { %391 = vmatpush.bf16.msra.mxu0 %v945_v15  ;;  %1084 = vmatpush.bf16.msra.mxu1 %v945_v15 }
  0x34   : > { %1085 = vmatpush.bf16.msra.mxu2 %v945_v15  ;;  %1086 = vmatpush.bf16.msra.mxu3 %v945_v15 }
  0x36   : > { %392 = vmatmul.bf16.vlgmr.msra.gmra.mxu0 %v937_v16  ;;  %402 = vmatmul.bf16.vlgmr.msra.gmra.mxu1 %v939_v17 }
  0x37   : > { %412 = vmatmul.bf16.vlgmr.msra.gmra.mxu2 %v941_v18  ;;  %422 = vmatmul.bf16.vlgmr.msra.gmra.mxu3 %v943_v19 }
  0x46   : > { %397 = vmatmul.bf16.gmra.mxu0 %v938_v20  ;;  %407 = vmatmul.bf16.gmra.mxu1 %v940_v21 }
  0x47   : > { %417 = vmatmul.bf16.gmra.mxu2 %v942_v22  ;;  %427 = vmatmul.bf16.gmra.mxu3 %v944_v23 }
  0xb3   : > { %v393_v24 = vpop.f32.mrf.mxu0  ;;  %v403_v25 = vpop.f32.mrf.mxu1 }
  0xba   : > { %v413_v26 = vpop.f32.mrf.mxu2  ;;  %v423_v27 = vpop.f32.mrf.mxu3 }
  0xbb   : > { %v395_v28 = vpop.f32.mrf.mxu0  ;;  %v405_v29 = vpop.f32.mrf.mxu1 }
  0xbc   : > { %v972_v30 = vpack.c.bf16 %v395_v28, %v393_v24  ;;  %v982_v31 = vpack.c.bf16 %v405_v29, %v403_v25 }
  0xbe   : > { %973 = vst [vmem:[#allocation2] sm:$0xff] %v972_v30  }
  0xbf   : > { %1050 = vst [vmem:[#allocation2 + $0x10] sm:$0xff] %v982_v31  }
  0xc2   : > { %v415_v32 = vpop.f32.mrf.mxu2  ;;  %v425_v33 = vpop.f32.mrf.mxu3 }
  0xc3   : > { %v992_v34 = vpack.c.bf16 %v415_v32, %v413_v26  ;;  %v1002_v35 = vpack.c.bf16 %v425_v33, %v423_v27  ;;  %v398_v36 = vpop.f32.mrf.mxu0  ;;  %v408_v37 = vpop.f32.mrf.mxu1 }
  0xc5   : > { %1052 = vst [vmem:[#allocation2 + $0x20] sm:$0xff] %v992_v34  }
  0xc6   : > { %1054 = vst [vmem:[#allocation2 + $0x30] sm:$0xff] %v1002_v35  }
  0xca   : > { %v418_v38 = vpop.f32.mrf.mxu2  ;;  %v428_v39 = vpop.f32.mrf.mxu3 }
  0xcb   : > { %v400_v40 = vpop.f32.mrf.mxu0  ;;  %v410_v41 = vpop.f32.mrf.mxu1 }
  0xcc   : > { %v977_v42 = vpack.c.bf16 %v400_v40, %v398_v36  ;;  %v987_v43 = vpack.c.bf16 %v410_v41, %v408_v37 }
  0xce   : > { %1049 = vst [vmem:[#allocation2 + $0x8] sm:$0xff] %v977_v42  }
  0xcf   : > { %1051 = vst [vmem:[#allocation2 + $0x18] sm:$0xff] %v987_v43  }
  0xd2   : > { %v420_v44 = vpop.f32.mrf.mxu2  ;;  %v430_v45 = vpop.f32.mrf.mxu3 }
  0xd3   : > { %v997_v46 = vpack.c.bf16 %v420_v44, %v418_v38  ;;  %v1007_v47 = vpack.c.bf16 %v430_v45, %v428_v39 }
  0xd5   : > { %1053 = vst [vmem:[#allocation2 + $0x28] sm:$0xff] %v997_v46  }
  0xd6   : > { %1055 = vst [vmem:[#allocation2 + $0x38] sm:$0xff] %v1007_v47  }
  0xd7 PF: > { %v967_v49 = vld [vmem:[#allocation2 + $0x30] sm:$0xff]  ;;  %v965_v51 = vld [vmem:[#allocation2 + $0x20] sm:$0xff]  ;;  %v964_v52 = vld [vmem:[#allocation2 + $0x18] sm:$0xff]  ;;  %p929_p7 = scmp.ne.s32.totalorder %s1150_s15, 0 }
  0xd8   : > { %v963_v53 = vld [vmem:[#allocation2 + $0x10] sm:$0xff]  ;;  %v962_v54 = vld [vmem:[#allocation2 + $0x8] sm:$0xff]  ;;  %v961_v55 = vld [vmem:[#allocation2] sm:$0xff] }
  0xd9   : > { %v953_v56 = vld [vmem:[%s1370_s0] sm:$0xff]  ;;  %v955_v57 = vld [vmem:[%s1370_s0 + $0x10] sm:$0xff]  ;;  %v954_v60 = vld [vmem:[%s1370_s0 + $0x8] sm:$0xff] }
  0xda   : > { %v957_v58 = vld [vmem:[%s1370_s0 + $0x20] sm:$0xff]  ;;  %v959_v59 = vld [vmem:[%s1370_s0 + $0x30] sm:$0xff]  ;;  %v956_v61 = vld [vmem:[%s1370_s0 + $0x18] sm:$0xff] }
  0xdb   : > { %v958_v62 = vld [vmem:[%s1370_s0 + $0x28] sm:$0xff]  ;;  %v960_v63 = vld [vmem:[%s1370_s0 + $0x38] sm:$0xff]  ;;  %v1135_v0 = vld [vmem:[%s1211_s23] ss:$0 sm:$0xff] }
  0xdc   : > { %v966_v50 = vld [vmem:[#allocation2 + $0x28] sm:$0xff] }
  0xdd   : > { %v968_v48 = vld [vmem:[#allocation2 + $0x38] sm:$0xff] }
  0xde   : > { %600 = vmatpush.bf16.msra.mxu0 %v968_v48  ;;  %1087 = vmatpush.bf16.msra.mxu1 %v968_v48 }
  0xdf   : > { %1088 = vmatpush.bf16.msra.mxu2 %v968_v48  ;;  %1089 = vmatpush.bf16.msra.mxu3 %v968_v48 }
  0xe2   : > { %601 = vmatpush.bf16.msra.mxu0 %v967_v49  ;;  %1090 = vmatpush.bf16.msra.mxu1 %v967_v49 }
  0xe3   : > { %1091 = vmatpush.bf16.msra.mxu2 %v967_v49  ;;  %1092 = vmatpush.bf16.msra.mxu3 %v967_v49 }
  0xe6   : > { %602 = vmatpush.bf16.msra.mxu0 %v966_v50  ;;  %1093 = vmatpush.bf16.msra.mxu1 %v966_v50 }
  0xe7   : > { %1094 = vmatpush.bf16.msra.mxu2 %v966_v50  ;;  %1095 = vmatpush.bf16.msra.mxu3 %v966_v50 }
  0xea   : > { %603 = vmatpush.bf16.msra.mxu0 %v965_v51  ;;  %1096 = vmatpush.bf16.msra.mxu1 %v965_v51 }
  0xeb   : > { %1097 = vmatpush.bf16.msra.mxu2 %v965_v51  ;;  %1098 = vmatpush.bf16.msra.mxu3 %v965_v51 }
  0xee   : > { %604 = vmatpush.bf16.msra.mxu0 %v964_v52  ;;  %1099 = vmatpush.bf16.msra.mxu1 %v964_v52 }
  0xef   : > { %1100 = vmatpush.bf16.msra.mxu2 %v964_v52  ;;  %1101 = vmatpush.bf16.msra.mxu3 %v964_v52 }
  0xf2   : > { %605 = vmatpush.bf16.msra.mxu0 %v963_v53  ;;  %1102 = vmatpush.bf16.msra.mxu1 %v963_v53 }
  0xf3   : > { %1103 = vmatpush.bf16.msra.mxu2 %v963_v53  ;;  %1104 = vmatpush.bf16.msra.mxu3 %v963_v53 }
  0xf6   : > { %606 = vmatpush.bf16.msra.mxu0 %v962_v54  ;;  %1105 = vmatpush.bf16.msra.mxu1 %v962_v54 }
  0xf7   : > { %1106 = vmatpush.bf16.msra.mxu2 %v962_v54  ;;  %1107 = vmatpush.bf16.msra.mxu3 %v962_v54 }
  0xfa   : > { %607 = vmatpush.bf16.msra.mxu0 %v961_v55  ;;  %1108 = vmatpush.bf16.msra.mxu1 %v961_v55 }
  0xfb   : > { %1109 = vmatpush.bf16.msra.mxu2 %v961_v55  ;;  %1110 = vmatpush.bf16.msra.mxu3 %v961_v55 }
  0xfd   : > { %608 = vmatmul.bf16.vlgmr.msra.gmra.mxu0 %v953_v56  ;;  %618 = vmatmul.bf16.vlgmr.msra.gmra.mxu1 %v955_v57 }
  0xfe   : > { %628 = vmatmul.bf16.vlgmr.msra.gmra.mxu2 %v957_v58  ;;  %638 = vmatmul.bf16.vlgmr.msra.gmra.mxu3 %v959_v59 }
 0x10d   : > { %613 = vmatmul.bf16.gmra.mxu0 %v954_v60  ;;  %623 = vmatmul.bf16.gmra.mxu1 %v956_v61 }
 0x10e   : > { %633 = vmatmul.bf16.gmra.mxu2 %v958_v62  ;;  %643 = vmatmul.bf16.gmra.mxu3 %v960_v63 }
 0x17a   : > { %v609_v1 = vpop.f32.mrf.mxu0  ;;  %v619_v2 = vpop.f32.mrf.mxu1 }
 0x17b   : > { %v1287_v3 = vadd.f32 %v1135_v0, %v609_v1  ;;  %v1289_v4 = vadd.f32 %v1135_v0, %v619_v2 }
 0x17d   : > { %v649_v5 = vmax.f32 %v1287_v3, 0.0  ;;  %v653_v6 = vmax.f32 %v1289_v4, 0.0 }
 0x181   : > { %v629_v7 = vpop.f32.mrf.mxu2  ;;  %v639_v8 = vpop.f32.mrf.mxu3 }
 0x182   : > { %v1293_v9 = vadd.f32 %v1135_v0, %v629_v7  ;;  %v1295_v10 = vadd.f32 %v1135_v0, %v639_v8  ;;  %v611_v11 = vpop.f32.mrf.mxu0  ;;  %v621_v12 = vpop.f32.mrf.mxu1 }
 0x183   : > { %v612_v13 = vadd.f32 %v1135_v0, %v611_v11  ;;  %v622_v14 = vadd.f32 %v1135_v0, %v621_v12 }
 0x184   : > { %v657_v15 = vmax.f32 %v1293_v9, 0.0  ;;  %v661_v16 = vmax.f32 %v1295_v10, 0.0 }
 0x185   : > { %v650_v17 = vmax.f32 %v612_v13, 0.0  ;;  %v654_v18 = vmax.f32 %v622_v14, 0.0 }
 0x189   : > { %v631_v19 = vpop.f32.mrf.mxu2  ;;  %v641_v20 = vpop.f32.mrf.mxu3 }
 0x18a   : > { %v632_v21 = vadd.f32 %v1135_v0, %v631_v19  ;;  %v642_v22 = vadd.f32 %v1135_v0, %v641_v20  ;;  %v614_v23 = vpop.f32.mrf.mxu0  ;;  %v624_v24 = vpop.f32.mrf.mxu1 }
 0x18b   : > { %v615_v25 = vadd.f32 %v1135_v0, %v614_v23  ;;  %v625_v26 = vadd.f32 %v1135_v0, %v624_v24 }
 0x18c   : > { %v658_v27 = vmax.f32 %v632_v21, 0.0  ;;  %v662_v28 = vmax.f32 %v642_v22, 0.0 }
 0x18d   : > { %v651_v29 = vmax.f32 %v615_v25, 0.0  ;;  %v655_v30 = vmax.f32 %v625_v26, 0.0 }
 0x191   : > { %v634_v31 = vpop.f32.mrf.mxu2  ;;  %v644_v32 = vpop.f32.mrf.mxu3 }
 0x192   : > { %v635_v33 = vadd.f32 %v1135_v0, %v634_v31  ;;  %v645_v34 = vadd.f32 %v1135_v0, %v644_v32  ;;  %v616_v35 = vpop.f32.mrf.mxu0  ;;  %v626_v36 = vpop.f32.mrf.mxu1 }
 0x193   : > { %v617_v37 = vadd.f32 %v1135_v0, %v616_v35  ;;  %v627_v38 = vadd.f32 %v1135_v0, %v626_v36 }
 0x194   : > { %v659_v39 = vmax.f32 %v635_v33, 0.0  ;;  %v663_v40 = vmax.f32 %v645_v34, 0.0 }
 0x195   : > { %v652_v41 = vmax.f32 %v617_v37, 0.0  ;;  %v656_v42 = vmax.f32 %v627_v38, 0.0 }
 0x198   : > { %667 = sbr.rel (%p929_p7) target bundleno = 423 (0x1a7), region = 48 }
 0x199   : > { %v636_v43 = vpop.f32.mrf.mxu2  ;;  %v646_v44 = vpop.f32.mrf.mxu3 }
 0x19a   : > { %v637_v45 = vadd.f32 %v1135_v0, %v636_v43  ;;  %v647_v46 = vadd.f32 %v1135_v0, %v646_v44 }
 0x19c   : > { %v660_v47 = vmax.f32 %v637_v45, 0.0  ;;  %v664_v48 = vmax.f32 %v647_v46, 0.0 }
 0x19d   : > { %v1012_v49 = vpack.c.bf16 %v650_v17, %v649_v5  ;;  %v1017_v50 = vpack.c.bf16 %v652_v41, %v651_v29  ;;  %v1022_v51 = vpack.c.bf16 %v654_v18, %v653_v6  ;;  %v1027_v52 = vpack.c.bf16 %v656_v42, %v655_v30 }
 0x19e   : > { %v1032_v53 = vpack.c.bf16 %v658_v27, %v657_v15  ;;  %v1037_v54 = vpack.c.bf16 %v660_v47, %v659_v39  ;;  %v1042_v55 = vpack.c.bf16 %v662_v28, %v661_v16  ;;  %v1047_v56 = vpack.c.bf16 %v664_v48, %v663_v40 }
 0x19f   : > { %1013 = vst [vmem:[#allocation3 + $0x30] sm:$0xff] %v1012_v49  }
 0x1a0   : > { %1056 = vst [vmem:[#allocation3] sm:$0xff] %v1017_v50  }
 0x1a1   : > { %1057 = vst [vmem:[#allocation3 + $0x18] sm:$0xff] %v1022_v51  }
 0x1a2   : > { %1058 = vst [vmem:[#allocation3 + $0x10] sm:$0xff] %v1027_v52  }
 0x1a3   : > { %1059 = vst [vmem:[#allocation3 + $0x8] sm:$0xff] %v1032_v53  }
 0x1a4   : > { %1060 = vst [vmem:[#allocation3 + $0x20] sm:$0xff] %v1037_v54  }
 0x1a5   : > { %1061 = vst [vmem:[#allocation3 + $0x28] sm:$0xff] %v1042_v55  }
 0x1a6   : > { %1062 = vst [vmem:[#allocation3 + $0x38] sm:$0xff] %v1047_v56  }
 0x1a7 PF: > { %p930_p8 = scmp.ne.s32.totalorder %s1150_s15, 1 }
 0x1a9   : > { %704 = sbr.rel (%p930_p8) target bundleno = 446 (0x1be), region = 52 }
 0x1ae   : > { %705 = vst [vmem:[%s1374_s4] sm:$0xff] %v649_v5 }
 0x1af   : > { %706 = vst [vmem:[%s1374_s4 + $0x8] sm:$0xff] %v650_v17 }
 0x1b0   : > { %707 = vst [vmem:[%s1374_s4 + $0x10] sm:$0xff] %v651_v29 }
 0x1b1   : > { %708 = vst [vmem:[%s1374_s4 + $0x18] sm:$0xff] %v652_v41 }
 0x1b2   : > { %709 = vst [vmem:[%s1374_s4 + $0x20] sm:$0xff] %v653_v6 }
 0x1b3   : > { %710 = vst [vmem:[%s1374_s4 + $0x28] sm:$0xff] %v654_v18 }
 0x1b4   : > { %711 = vst [vmem:[%s1374_s4 + $0x30] sm:$0xff] %v655_v30 }
 0x1b5   : > { %712 = vst [vmem:[%s1374_s4 + $0x38] sm:$0xff] %v656_v42 }
 0x1b6   : > { %713 = vst [vmem:[%s1374_s4 + $0x40] sm:$0xff] %v657_v15 }
 0x1b7   : > { %714 = vst [vmem:[%s1374_s4 + $0x48] sm:$0xff] %v658_v27 }
 0x1b8   : > { %715 = vst [vmem:[%s1374_s4 + $0x50] sm:$0xff] %v659_v39 }
 0x1b9   : > { %716 = vst [vmem:[%s1374_s4 + $0x58] sm:$0xff] %v660_v47 }
 0x1ba   : > { %717 = vst [vmem:[%s1374_s4 + $0x60] sm:$0xff] %v661_v16 }
 0x1bb   : > { %718 = vst [vmem:[%s1374_s4 + $0x68] sm:$0xff] %v662_v28 }
 0x1bc   : > { %719 = vst [vmem:[%s1374_s4 + $0x70] sm:$0xff] %v663_v40 }
 0x1bd   : > { %720 = vst [vmem:[%s1374_s4 + $0x78] sm:$0xff] %v664_v48 }
 0x1be PF: > { %s14_s17 = sadd.s32 1, %s1158_s17   ;;  %s1375_s15 = smov %s1154_s16 }
 0x1bf   : > { %p11_p9 = scmp.ge.s32.totalorder %s14_s17, 4   ;;  %s1376_s16 = smov %s1378_s18 }
 0x1c1   :  { %13 = sbr.rel (!%p11_p9) target bundleno = 2 (0x2), region = 84 }

</bundles_post_ra>
